<compile_context>
chip_gen: v6e
topology: v6e:2x2x1
jax: 0.10.0
libtpu: 0.0.40
codegen_flags: <defaults>
</compile_context>

<pallas_src>
import functools

import jax
import jax.numpy as jnp
from jax.experimental import pallas as pl
from jax.experimental.pallas import tpu as pltpu

LANE = 128      # TPU lane width: pad all feature dims to this
SUBLANE = 8     # sublane multiple for the batch dim


# ---------------------------------------------------------------------------
# Kernels
# ---------------------------------------------------------------------------

def _mlp_grad(y, w1_ref, b1_ref, w2_ref, b2_ref, w3_ref, b3_ref):
    """gradient_net(y): Linear -> Tanh -> Linear -> Tanh -> Linear (all f32)."""
    h1 = jnp.tanh(
        jnp.dot(y, w1_ref[...], preferred_element_type=jnp.float32) + b1_ref[...]
    )
    h2 = jnp.tanh(
        jnp.dot(h1, w2_ref[...], preferred_element_type=jnp.float32) + b2_ref[...]
    )
    return jnp.dot(h2, w3_ref[...], preferred_element_type=jnp.float32) + b3_ref[...]


def _ode_grad_kernel(y_ref, w1_ref, b1_ref, w2_ref, b2_ref, w3_ref, b3_ref,
                     out_ref, *, backwards):
    """One ODEFunc.forward evaluation on a (Bt, 128) batch tile."""
    g = _mlp_grad(y_ref[...], w1_ref, b1_ref, w2_ref, b2_ref, w3_ref, b3_ref)
    out_ref[...] = -g if backwards else g


def _ode_euler_kernel(y0_ref, w1_ref, b1_ref, w2_ref, b2_ref, w3_ref, b3_ref,
                      y_ref, *, step):
    """Time-fused solver: grid=(batch_tiles, T).

    The output block (constant over the inner t axis) stays resident in VMEM and
    is used as the carry for y; weights are resident for the whole grid.
    """
    t = pl.program_id(1)

    @pl.when(t == 0)
    def _():
        y_ref[...] = y0_ref[...]

    y = y_ref[...]
    g = _mlp_grad(y, w1_ref, b1_ref, w2_ref, b2_ref, w3_ref, b3_ref)
    y_ref[...] = y + step * g   # explicit Euler: y += dt * dy/dt


# ---------------------------------------------------------------------------
# Parameters (mirror init_network_weights) + padding to lane-aligned shapes
# ---------------------------------------------------------------------------

def init_ode_func_params(key, latent_dim, n_units, std=0.1):
    """Weights ~ N(0, std), bias = 0.  Stored transposed (in, out) for x @ W."""
    L, U = latent_dim, n_units
    ks = jax.random.split(key, 3)

    def lin(k, in_dim, out_dim):
        w = std * jax.random.normal(k, (out_dim, in_dim), dtype=jnp.float32)  # torch (out,in)
        return w.T, jnp.zeros((1, out_dim), dtype=jnp.float32)

    w1, b1 = lin(ks[0], L, U)
    w2, b2 = lin(ks[1], U, U)
    w3, b3 = lin(ks[2], U, L)
    return dict(w1=w1, b1=b1, w2=w2, b2=b2, w3=w3, b3=b3)


def _pad2(a, rows, cols):
    return jnp.zeros((rows, cols), a.dtype).at[: a.shape[0], : a.shape[1]].set(a)


def _pad_params(params):
    """Zero-pad every feature dim (L, U) up to 128 lanes.  Exact."""
    Lp = Up = LANE
    return dict(
        w1=_pad2(params["w1"], Lp, Up), b1=_pad2(params["b1"], 1, Up),
        w2=_pad2(params["w2"], Up, Up), b2=_pad2(params["b2"], 1, Up),
        w3=_pad2(params["w3"], Up, Lp), b3=_pad2(params["b3"], 1, Lp),
    )


def _pad_batch(B):
    Bp = pl.cdiv(B, SUBLANE) * SUBLANE
    Bt = min(Bp, 512)                 # batch tile (fits VMEM with huge margin on v5e/v6e/v7x)
    Bp = pl.cdiv(Bp, Bt) * Bt
    return Bp, Bt


_CONST_W = lambda *idx: (0, 0)        # weights/biases: resident, same block for every grid point


# ---------------------------------------------------------------------------
# Wrappers
# ---------------------------------------------------------------------------

@functools.partial(jax.jit, static_argnames=("backwards",))
def ode_func_forward(t_local, y, params, backwards=False):
    """Exact ODEFunc.forward: dy/dt = gradient_net(y), negated if backwards."""
    del t_local  # get_ode_gradient_nn ignores the time point, as in the module
    B, L = y.shape
    pp = _pad_params(params)
    Lp = Up = LANE
    Bp, Bt = _pad_batch(B)
    y_pad = jnp.zeros((Bp, Lp), jnp.float32).at[:B, :L].set(y.astype(jnp.float32))

    kernel = functools.partial(_ode_grad_kernel, backwards=bool(backwards))
    grad_pad = pl.pallas_call(
        kernel,
        out_shape=jax.ShapeDtypeStruct((Bp, Lp), jnp.float32),
        grid=(Bp // Bt,),
        in_specs=[
            pl.BlockSpec((Bt, Lp), lambda i: (i, 0)),   # y tile
            pl.BlockSpec((Lp, Up), _CONST_W),           # w1 (resident)
            pl.BlockSpec((1, Up), _CONST_W),            # b1
            pl.BlockSpec((Up, Up), _CONST_W),           # w2
            pl.BlockSpec((1, Up), _CONST_W),            # b2
            pl.BlockSpec((Up, Lp), _CONST_W),           # w3
            pl.BlockSpec((1, Lp), _CONST_W),            # b3
        ],
        out_specs=pl.BlockSpec((Bt, Lp), lambda i: (i, 0)),
        compiler_params=pltpu.CompilerParams(dimension_semantics=("parallel",)),
    )(y_pad, pp["w1"], pp["b1"], pp["w2"], pp["b2"], pp["w3"], pp["b3"])
    return grad_pad[:B, :L]


@functools.partial(jax.jit, static_argnames=("n_steps", "dt", "backwards"))
def ode_solve_euler(y0, params, *, n_steps, dt, backwards=False):
    """Time-fused version: n_steps explicit-Euler steps of ODEFunc in ONE
    pallas_call.  Weights loaded into VMEM once; y never leaves VMEM between
    steps (carried in the resident output block)."""
    B, L = y0.shape
    pp = _pad_params(params)
    Lp = Up = LANE
    Bp, Bt = _pad_batch(B)
    y0_pad = jnp.zeros((Bp, Lp), jnp.float32).at[:B, :L].set(y0.astype(jnp.float32))

    step = float(dt) * (-1.0 if backwards else 1.0)
    kernel = functools.partial(_ode_euler_kernel, step=step)
    yT_pad = pl.pallas_call(
        kernel,
        out_shape=jax.ShapeDtypeStruct((Bp, Lp), jnp.float32),
        grid=(Bp // Bt, int(n_steps)),                  # (batch-parallel, time-arbitrary)
        in_specs=[
            pl.BlockSpec((Bt, Lp), lambda b, t: (b, 0)),  # y0 tile (read at t==0 only)
            pl.BlockSpec((Lp, Up), _CONST_W),
            pl.BlockSpec((1, Up), _CONST_W),
            pl.BlockSpec((Up, Up), _CONST_W),
            pl.BlockSpec((1, Up), _CONST_W),
            pl.BlockSpec((Up, Lp), _CONST_W),
            pl.BlockSpec((1, Lp), _CONST_W),
        ],
        out_specs=pl.BlockSpec((Bt, Lp), lambda b, t: (b, 0)),  # resident carry for y
        input_output_aliases={0: 0},                    # y0 buffer reused for y_T
        compiler_params=pltpu.CompilerParams(
            dimension_semantics=("parallel", "arbitrary")),
    )(y0_pad, pp["w1"], pp["b1"], pp["w2"], pp["b2"], pp["w3"], pp["b3"])
    return yT_pad[:B, :L]


# ---------------------------------------------------------------------------
# Plain-JAX references
# ---------------------------------------------------------------------------

def ode_func_reference(t_local, y, params, backwards=False):
    del t_local
    h1 = jnp.tanh(y @ params["w1"] + params["b1"])
    h2 = jnp.tanh(h1 @ params["w2"] + params["b2"])
    g = h2 @ params["w3"] + params["b3"]
    return -g if backwards else g


# ---------------------------------------------------------------------------
# Test
# ---------------------------------------------------------------------------

if __name__ == "__main__":
    batch, latent_dim, n_units = 8, 32, 100

    key = jax.random.PRNGKey(0)
    k_y, k_p = jax.random.split(key)
    y = jax.random.normal(k_y, (batch, latent_dim), dtype=jnp.float32)
    params = init_ode_func_params(k_p, latent_dim, n_units, std=0.1)
    t_local = jnp.float32(0.0)

    # Single ODEFunc.forward evaluation (forward and backwards).
    grad = jax.block_until_ready(ode_func_forward(t_local, y, params, backwards=False))
    grad_ref = ode_func_reference(t_local, y, params, backwards=False)
    assert grad.shape == (batch, latent_dim)
    assert jnp.allclose(grad, grad_ref, atol=1e-5, rtol=1e-5), "forward grad mismatch"

    grad_b = jax.block_until_ready(ode_func_forward(t_local, y, params, backwards=True))
    assert jnp.allclose(grad_b, -grad_ref, atol=1e-5, rtol=1e-5), "backwards grad mismatch"

    # Time-fused solver (one pallas_call for all steps, weights resident in VMEM).
    n_steps, dt = 16, 0.05
    y_T = jax.block_until_ready(ode_solve_euler(y, params, n_steps=n_steps, dt=dt))
    y_ref = y
    for _ in range(n_steps):
        y_ref = y_ref + dt * ode_func_reference(t_local, y_ref, params)
    assert y_T.shape == (batch, latent_dim)
    assert jnp.allclose(y_T, y_ref, atol=1e-4, rtol=1e-4), "fused Euler mismatch"

    print("KERNEL_OK")
</pallas_src>

<mosaic_0001>
module attributes {stable_mosaic.version = 11 : i64} {
  func.func @_ode_grad_kernel(%arg0: i32, %arg1: memref<8x128xf32, #tpu.memory_space<vmem>>, %arg2: memref<128x128xf32, #tpu.memory_space<vmem>>, %arg3: memref<1x128xf32, #tpu.memory_space<vmem>>, %arg4: memref<128x128xf32, #tpu.memory_space<vmem>>, %arg5: memref<1x128xf32, #tpu.memory_space<vmem>>, %arg6: memref<128x128xf32, #tpu.memory_space<vmem>>, %arg7: memref<1x128xf32, #tpu.memory_space<vmem>>, %arg8: memref<8x128xf32, #tpu.memory_space<vmem>>) attributes {dimension_semantics = [#tpu.dimension_semantics<parallel>], iteration_bounds = array<i64: 1>, scalar_prefetch = 0 : i64, scratch_operands = 0 : i64, tpu.core_type = #tpu.core_type<tc>, window_params = [{transform_indices = @transform_0, window_bounds = array<i64: 8, 128>}, {pipeline_mode = #tpu.pipeline_mode<synchronous>, transform_indices = @transform_1, window_bounds = array<i64: 128, 128>}, {pipeline_mode = #tpu.pipeline_mode<synchronous>, transform_indices = @transform_2, window_bounds = array<i64: 1, 128>}, {pipeline_mode = #tpu.pipeline_mode<synchronous>, transform_indices = @transform_3, window_bounds = array<i64: 128, 128>}, {pipeline_mode = #tpu.pipeline_mode<synchronous>, transform_indices = @transform_4, window_bounds = array<i64: 1, 128>}, {pipeline_mode = #tpu.pipeline_mode<synchronous>, transform_indices = @transform_5, window_bounds = array<i64: 128, 128>}, {pipeline_mode = #tpu.pipeline_mode<synchronous>, transform_indices = @transform_6, window_bounds = array<i64: 1, 128>}, {transform_indices = @transform_7, window_bounds = array<i64: 8, 128>}]} {
    %c0 = arith.constant 0 : index
    %c0_0 = arith.constant 0 : index
    %0 = vector.load %arg1[%c0, %c0_0] : memref<8x128xf32, #tpu.memory_space<vmem>>, vector<8x128xf32>
    %c0_1 = arith.constant 0 : index
    %c0_2 = arith.constant 0 : index
    %1 = vector.load %arg2[%c0_1, %c0_2] : memref<128x128xf32, #tpu.memory_space<vmem>>, vector<128x128xf32>
    %cst = arith.constant dense<0.000000e+00> : vector<8x128xf32>
    %2 = tpu.matmul %0, %1, %cst {dimension_numbers = #tpu.dot_dimension_numbers<[1], [0], [0], [1], [0, 0, 1, 1], [], []>} : vector<8x128xf32>, vector<128x128xf32>, vector<8x128xf32> -> vector<8x128xf32>
    %c0_3 = arith.constant 0 : index
    %c0_4 = arith.constant 0 : index
    %3 = vector.load %arg3[%c0_3, %c0_4] : memref<1x128xf32, #tpu.memory_space<vmem>>, vector<1x128xf32>
    %4 = vector.broadcast %3 : vector<1x128xf32> to vector<8x128xf32>
    %5 = arith.addf %2, %4 : vector<8x128xf32>
    %6 = math.tanh %5 : vector<8x128xf32>
    %c0_5 = arith.constant 0 : index
    %c0_6 = arith.constant 0 : index
    %7 = vector.load %arg4[%c0_5, %c0_6] : memref<128x128xf32, #tpu.memory_space<vmem>>, vector<128x128xf32>
    %cst_7 = arith.constant dense<0.000000e+00> : vector<8x128xf32>
    %8 = tpu.matmul %6, %7, %cst_7 {dimension_numbers = #tpu.dot_dimension_numbers<[1], [0], [0], [1], [0, 0, 1, 1], [], []>} : vector<8x128xf32>, vector<128x128xf32>, vector<8x128xf32> -> vector<8x128xf32>
    %c0_8 = arith.constant 0 : index
    %c0_9 = arith.constant 0 : index
    %9 = vector.load %arg5[%c0_8, %c0_9] : memref<1x128xf32, #tpu.memory_space<vmem>>, vector<1x128xf32>
    %10 = vector.broadcast %9 : vector<1x128xf32> to vector<8x128xf32>
    %11 = arith.addf %8, %10 : vector<8x128xf32>
    %12 = math.tanh %11 : vector<8x128xf32>
    %c0_10 = arith.constant 0 : index
    %c0_11 = arith.constant 0 : index
    %13 = vector.load %arg6[%c0_10, %c0_11] : memref<128x128xf32, #tpu.memory_space<vmem>>, vector<128x128xf32>
    %cst_12 = arith.constant dense<0.000000e+00> : vector<8x128xf32>
    %14 = tpu.matmul %12, %13, %cst_12 {dimension_numbers = #tpu.dot_dimension_numbers<[1], [0], [0], [1], [0, 0, 1, 1], [], []>} : vector<8x128xf32>, vector<128x128xf32>, vector<8x128xf32> -> vector<8x128xf32>
    %c0_13 = arith.constant 0 : index
    %c0_14 = arith.constant 0 : index
    %15 = vector.load %arg7[%c0_13, %c0_14] : memref<1x128xf32, #tpu.memory_space<vmem>>, vector<1x128xf32>
    %16 = vector.broadcast %15 : vector<1x128xf32> to vector<8x128xf32>
    %17 = arith.addf %14, %16 : vector<8x128xf32>
    %c0_15 = arith.constant 0 : index
    %c0_16 = arith.constant 0 : index
    %18 = vector.load %arg8[%c0_15, %c0_16] : memref<8x128xf32, #tpu.memory_space<vmem>>, vector<8x128xf32>
    tpu.vector_store %arg8[%c0_15, %c0_16], %17 {strides = array<i32>} : memref<8x128xf32, #tpu.memory_space<vmem>>, vector<8x128xf32>,
    return
  }
  func.func @transform_0(%arg0: i32) -> (i32, i32) {
    %c0_i32 = arith.constant 0 : i32
    %c0_i32_0 = arith.constant 0 : i32
    return %arg0, %c0_i32 : i32, i32
  }
  func.func @transform_1(%arg0: i32) -> (i32, i32) {
    %c0_i32 = arith.constant 0 : i32
    %c0_i32_0 = arith.constant 0 : i32
    %c0_i32_1 = arith.constant 0 : i32
    return %c0_i32, %c0_i32_0 : i32, i32
  }
  func.func @transform_2(%arg0: i32) -> (i32, i32) {
    %c0_i32 = arith.constant 0 : i32
    %c0_i32_0 = arith.constant 0 : i32
    %c0_i32_1 = arith.constant 0 : i32
    return %c0_i32, %c0_i32_0 : i32, i32
  }
  func.func @transform_3(%arg0: i32) -> (i32, i32) {
    %c0_i32 = arith.constant 0 : i32
    %c0_i32_0 = arith.constant 0 : i32
    %c0_i32_1 = arith.constant 0 : i32
    return %c0_i32, %c0_i32_0 : i32, i32
  }
  func.func @transform_4(%arg0: i32) -> (i32, i32) {
    %c0_i32 = arith.constant 0 : i32
    %c0_i32_0 = arith.constant 0 : i32
    %c0_i32_1 = arith.constant 0 : i32
    return %c0_i32, %c0_i32_0 : i32, i32
  }
  func.func @transform_5(%arg0: i32) -> (i32, i32) {
    %c0_i32 = arith.constant 0 : i32
    %c0_i32_0 = arith.constant 0 : i32
    %c0_i32_1 = arith.constant 0 : i32
    return %c0_i32, %c0_i32_0 : i32, i32
  }
  func.func @transform_6(%arg0: i32) -> (i32, i32) {
    %c0_i32 = arith.constant 0 : i32
    %c0_i32_0 = arith.constant 0 : i32
    %c0_i32_1 = arith.constant 0 : i32
    return %c0_i32, %c0_i32_0 : i32, i32
  }
  func.func @transform_7(%arg0: i32) -> (i32, i32) {
    %c0_i32 = arith.constant 0 : i32
    %c0_i32_0 = arith.constant 0 : i32
    return %arg0, %c0_i32 : i32, i32
  }
}

</mosaic_0001>

<bundles_post_ra>
// kernel: ode_func_forward.1
= control target key start
LH: loop header
LB: loop body
LE: loop exit
PB: predicated region body
PF: predicated region fallthrough
CT: control target
= control target key end

     0   :  { %v512_v1 = vmov 0.0   ;;  %vm513_vm0 = vmmov 0   ;;  %s768_s0 = inlined_call_operand.vmem [shape: f32[8,128], index: 0, kind: input, shape index: {}]   ;;  %s769_s1 = inlined_call_operand.vmem [shape: f32[128,128], index: 1, kind: input, shape index: {}]   ;;  %s770_s2 = inlined_call_operand.vmem [shape: f32[1,128], index: 2, kind: input, shape index: {}]   ;;  %s771_s3 = inlined_call_operand.vmem [shape: f32[128,128], index: 3, kind: input, shape index: {}]   ;;  %s772_s4 = inlined_call_operand.vmem [shape: f32[1,128], index: 4, kind: input, shape index: {}]   ;;  %s773_s5 = inlined_call_operand.vmem [shape: f32[128,128], index: 5, kind: input, shape index: {}]   ;;  %s774_s6 = inlined_call_operand.vmem [shape: f32[1,128], index: 6, kind: input, shape index: {}]   ;;  %s775_s7 = inlined_call_operand.hbm [shape: f32[8,128], index: 7, kind: output, shape index: {}]  }
   0x1   :  { %v43_v0 = vld [vmem:[%s769_s1 + $0x78] sm:$0xff]  ;;  %378 = vmatprep.subr.mxu0 %v512_v1  ;;  %v42_v2 = vld [vmem:[%s769_s1 + $0x70] sm:$0xff]  ;;  %410 = vmatprep.mubr.msk.f32.mxu0 %vm513_vm0, %v512_v1  ;;  %v41_v3 = vld [vmem:[%s769_s1 + $0x68] sm:$0xff] }
   0x2   :  { %379 = vmatpush3.msra.mxu0 %v43_v0  ;;  %413 = vmatprep.subr.mxu1 %v512_v1  ;;  %v40_v4 = vld [vmem:[%s769_s1 + $0x60] sm:$0xff]  ;;  %v137_v5 = vld [vmem:[%s771_s3 + $0x78] sm:$0xff]  ;;  %v136_v6 = vld [vmem:[%s771_s3 + $0x70] sm:$0xff] }
   0x3   :  { %380 = vmatprep.subr.mxu0 %v512_v1  ;;  %445 = vmatprep.mubr.msk.f32.mxu1 %vm513_vm0, %v512_v1  ;;  %v39_v7 = vld [vmem:[%s769_s1 + $0x58] sm:$0xff]  ;;  %v135_v8 = vld [vmem:[%s771_s3 + $0x68] sm:$0xff] }
   0x4   :  { %381 = vmatpush3.msra.mxu0 %v42_v2  ;;  %414 = vmatpush3.msra.mxu1 %v137_v5 }
   0x5   :  { %382 = vmatprep.subr.mxu0 %v512_v1  ;;  %415 = vmatprep.subr.mxu1 %v512_v1 }
   0x6   :  { %383 = vmatpush3.msra.mxu0 %v41_v3  ;;  %416 = vmatpush3.msra.mxu1 %v136_v6 }
   0x7   :  { %384 = vmatprep.subr.mxu0 %v512_v1 }
   0x8   :  { %385 = vmatpush3.msra.mxu0 %v40_v4 }
   0x9   :  { %12 = vsyncpa [#allocation3], 0  ;;  %386 = vmatprep.subr.mxu0 %v512_v1  ;;  %v38_v9 = vld [vmem:[%s769_s1 + $0x50] sm:$0xff]  ;;  %417 = vmatprep.subr.mxu1 %v512_v1  ;;  %v134_v10 = vld [vmem:[%s771_s3 + $0x60] sm:$0xff]  ;;  %s514_s28 = smov [#allocation2]  }
   0xa   :  { %387 = vmatpush3.msra.mxu0 %v39_v7  ;;  %418 = vmatpush3.msra.mxu1 %v135_v8  ;;  %v37_v11 = vld [vmem:[%s769_s1 + $0x48] sm:$0xff]  ;;  %v133_v12 = vld [vmem:[%s771_s3 + $0x58] sm:$0xff]  ;;  %v36_v13 = vld [vmem:[%s769_s1 + $0x40] sm:$0xff] }
   0xb   :  { %388 = vmatprep.subr.mxu0 %v512_v1  ;;  %419 = vmatprep.subr.mxu1 %v512_v1  ;;  %v132_v14 = vld [vmem:[%s771_s3 + $0x50] sm:$0xff]  ;;  %v35_v15 = vld [vmem:[%s769_s1 + $0x38] sm:$0xff]  ;;  %v131_v16 = vld [vmem:[%s771_s3 + $0x48] sm:$0xff] }
   0xc   :  { %389 = vmatpush3.msra.mxu0 %v38_v9  ;;  %420 = vmatpush3.msra.mxu1 %v134_v10  ;;  %v34_v17 = vld [vmem:[%s769_s1 + $0x30] sm:$0xff]  ;;  %v33_v18 = vld [vmem:[%s769_s1 + $0x28] sm:$0xff]  ;;  %v32_v19 = vld [vmem:[%s769_s1 + $0x20] sm:$0xff] }
   0xd   :  { %390 = vmatprep.subr.mxu0 %v512_v1  ;;  %421 = vmatprep.subr.mxu1 %v512_v1  ;;  %v31_v20 = vld [vmem:[%s769_s1 + $0x18] sm:$0xff]  ;;  %v30_v21 = vld [vmem:[%s769_s1 + $0x10] sm:$0xff]  ;;  %v29_v22 = vld [vmem:[%s769_s1 + $0x8] sm:$0xff] }
   0xe   :  { %391 = vmatpush3.msra.mxu0 %v37_v11  ;;  %422 = vmatpush3.msra.mxu1 %v133_v12  ;;  %v28_v23 = vld [vmem:[%s769_s1] sm:$0xff]  ;;  %v129_v26 = vld [vmem:[%s771_s3 + $0x38] sm:$0xff]  ;;  %v128_v27 = vld [vmem:[%s771_s3 + $0x30] sm:$0xff] }
   0xf   :  { %392 = vmatprep.subr.mxu0 %v512_v1  ;;  %423 = vmatprep.subr.mxu1 %v512_v1  ;;  %v27_v24 = vld [vmem:[%s768_s0] sm:$0xff]  ;;  %v127_v28 = vld [vmem:[%s771_s3 + $0x28] sm:$0xff]  ;;  %v125_v30 = vld [vmem:[%s771_s3 + $0x18] sm:$0xff] }
  0x10   :  { %393 = vmatpush3.msra.mxu0 %v36_v13  ;;  %424 = vmatpush3.msra.mxu1 %v132_v14  ;;  %v130_v25 = vld [vmem:[%s771_s3 + $0x40] sm:$0xff]  ;;  %v124_v31 = vld [vmem:[%s771_s3 + $0x10] sm:$0xff]  ;;  %v123_v32 = vld [vmem:[%s771_s3 + $0x8] sm:$0xff] }
  0x11   :  { %394 = vmatprep.subr.mxu0 %v512_v1  ;;  %425 = vmatprep.subr.mxu1 %v512_v1  ;;  %v126_v29 = vld [vmem:[%s771_s3 + $0x20] sm:$0xff]  ;;  %v231_v34 = vld [vmem:[%s773_s5 + $0x78] sm:$0xff]  ;;  %v230_v35 = vld [vmem:[%s773_s5 + $0x70] sm:$0xff] }
  0x12   :  { %395 = vmatpush3.msra.mxu0 %v35_v15  ;;  %426 = vmatpush3.msra.mxu1 %v131_v16  ;;  %v122_v33 = vld [vmem:[%s771_s3] sm:$0xff]  ;;  %v229_v36 = vld [vmem:[%s773_s5 + $0x68] sm:$0xff]  ;;  %v227_v38 = vld [vmem:[%s773_s5 + $0x58] sm:$0xff] }
  0x13   :  { %396 = vmatprep.subr.mxu0 %v512_v1  ;;  %427 = vmatprep.subr.mxu1 %v512_v1  ;;  %v228_v37 = vld [vmem:[%s773_s5 + $0x60] sm:$0xff]  ;;  %v226_v39 = vld [vmem:[%s773_s5 + $0x50] sm:$0xff]  ;;  %v225_v40 = vld [vmem:[%s773_s5 + $0x48] sm:$0xff] }
  0x14   :  { %397 = vmatpush3.msra.mxu0 %v34_v17  ;;  %428 = vmatpush3.msra.mxu1 %v130_v25  ;;  %v324_v41 = vld [vmem:[%s770_s2] ss:$0 sm:$0xff]  ;;  %v223_v47 = vld [vmem:[%s773_s5 + $0x38] sm:$0xff]  ;;  %v222_v48 = vld [vmem:[%s773_s5 + $0x30] sm:$0xff] }
  0x15   :  { %398 = vmatprep.subr.mxu0 %v512_v1  ;;  %429 = vmatprep.subr.mxu1 %v512_v1  ;;  %v224_v46 = vld [vmem:[%s773_s5 + $0x40] sm:$0xff]  ;;  %v221_v49 = vld [vmem:[%s773_s5 + $0x28] sm:$0xff]  ;;  %v219_v51 = vld [vmem:[%s773_s5 + $0x18] sm:$0xff] }
  0x16   :  { %399 = vmatpush3.msra.mxu0 %v33_v18  ;;  %430 = vmatpush3.msra.mxu1 %v129_v26  ;;  %v220_v50 = vld [vmem:[%s773_s5 + $0x20] sm:$0xff]  ;;  %v218_v52 = vld [vmem:[%s773_s5 + $0x10] sm:$0xff]  ;;  %v217_v53 = vld [vmem:[%s773_s5 + $0x8] sm:$0xff] }
  0x17   :  { %400 = vmatprep.subr.mxu0 %v512_v1  ;;  %431 = vmatprep.subr.mxu1 %v512_v1  ;;  %v216_v54 = vld [vmem:[%s773_s5] sm:$0xff]  ;;  %s316_s5 = sshll.u32 %s514_s28, 4  ;;  %s317_s5 = int_to_ptr.vmem [resolvable:$true] %s316_s5 }
  0x18   :  { %401 = vmatpush3.msra.mxu0 %v32_v19  ;;  %432 = vmatpush3.msra.mxu1 %v128_v27  ;;  %v325_v55 = vld [vmem:[%s772_s4] ss:$0 sm:$0xff]  ;;  %s490_s0 = scalar_lea.vmem %s317_s5, 128  ;;  %p495_p1 = scmp.lt.s32.totalorder %s317_s5, %s317_s5 }
  0x19   :  { %402 = vmatprep.subr.mxu0 %v512_v1  ;;  %433 = vmatprep.subr.mxu1 %v512_v1  ;;  %v326_v60 = vld [vmem:[%s774_s6] ss:$0 sm:$0xff]  ;;  %p491_p0 = scmp.ne.s32.totalorder %s317_s5, %s490_s0  ;;  %p496_p2 = scmp.lt.s32.totalorder %s490_s0, %s490_s0 }
  0x1a   :  { %403 = vmatpush3.msra.mxu0 %v31_v20  ;;  %434 = vmatpush3.msra.mxu1 %v127_v28 }
  0x1b   :  { %404 = vmatprep.subr.mxu0 %v512_v1  ;;  %435 = vmatprep.subr.mxu1 %v512_v1  ;;  %p497_p3 = por %p496_p2, %p495_p1 }
  0x1c   :  { %405 = vmatpush3.msra.mxu0 %v30_v21  ;;  %436 = vmatpush3.msra.mxu1 %v126_v29 }
  0x1d   :  { %406 = vmatprep.subr.mxu0 %v512_v1  ;;  %437 = vmatprep.subr.mxu1 %v512_v1  ;;  %p498_p4 = pnand %p497_p3, %p491_p0 }
  0x1e   :  { %407 = vmatpush3.msra.mxu0 %v29_v22  ;;  %438 = vmatpush3.msra.mxu1 %v125_v30 }
  0x1f   :  { %408 = vmatprep.subr.mxu0 %v512_v1  ;;  %439 = vmatprep.subr.mxu1 %v512_v1 }
  0x20   :  { %409 = vmatpush3.msra.mxu0 %v28_v23  ;;  %440 = vmatpush3.msra.mxu1 %v124_v31 }
  0x21   :  { %411 = vmatmul.mubr.f32.vlgmr.msra.gmra.mxu0 %v27_v24  ;;  %448 = vmatprep.subr.mxu0 %v512_v1 }
  0x22   :  { %480 = vmatprep.mubr.msk.f32.mxu0 %vm513_vm0, %v512_v1  ;;  %441 = vmatprep.subr.mxu1 %v512_v1 }
  0x23   :  { %442 = vmatpush3.msra.mxu1 %v123_v32  ;;  %449 = vmatpush3.msra.mxu0 %v231_v34 }
  0x24   :  { %443 = vmatprep.subr.mxu1 %v512_v1  ;;  %450 = vmatprep.subr.mxu0 %v512_v1 }
  0x25   :  { %444 = vmatpush3.msra.mxu1 %v122_v33  ;;  %451 = vmatpush3.msra.mxu0 %v230_v35 }
  0x26   :  { %452 = vmatprep.subr.mxu0 %v512_v1 }
  0x27   :  { %453 = vmatpush3.msra.mxu0 %v229_v36 }
  0x28   :  { %454 = vmatprep.subr.mxu0 %v512_v1 }
  0x29   :  { %455 = vmatpush3.msra.mxu0 %v228_v37 }
  0x2a   :  { %456 = vmatprep.subr.mxu0 %v512_v1 }
  0x2b   :  { %457 = vmatpush3.msra.mxu0 %v227_v38 }
  0x2c   :  { %458 = vmatprep.subr.mxu0 %v512_v1 }
  0x2d   :  { %459 = vmatpush3.msra.mxu0 %v226_v39 }
  0x2e   :  { %460 = vmatprep.subr.mxu0 %v512_v1 }
  0x2f   :  { %461 = vmatpush3.msra.mxu0 %v225_v40 }
  0x30   :  { %462 = vmatprep.subr.mxu0 %v512_v1 }
  0x31   :  { %463 = vmatpush3.msra.mxu0 %v224_v46 }
  0x32   :  { %464 = vmatprep.subr.mxu0 %v512_v1 }
  0x33   :  { %465 = vmatpush3.msra.mxu0 %v223_v47 }
  0x34   :  { %466 = vmatprep.subr.mxu0 %v512_v1 }
  0x35   :  { %467 = vmatpush3.msra.mxu0 %v222_v48 }
  0x36   :  { %468 = vmatprep.subr.mxu0 %v512_v1 }
  0x37   :  { %469 = vmatpush3.msra.mxu0 %v221_v49 }
  0x38   :  { %470 = vmatprep.subr.mxu0 %v512_v1 }
  0x39   :  { %471 = vmatpush3.msra.mxu0 %v220_v50 }
  0x3a   :  { %472 = vmatprep.subr.mxu0 %v512_v1 }
  0x3b   :  { %473 = vmatpush3.msra.mxu0 %v219_v51 }
  0x3c   :  { %474 = vmatprep.subr.mxu0 %v512_v1 }
  0x3d   :  { %475 = vmatpush3.msra.mxu0 %v218_v52 }
  0x3e   :  { %476 = vmatprep.subr.mxu0 %v512_v1 }
  0x3f   :  { %477 = vmatpush3.msra.mxu0 %v217_v53 }
  0x40   :  { %478 = vmatprep.subr.mxu0 %v512_v1 }
  0x41   :  { %479 = vmatpush3.msra.mxu0 %v216_v54 }
  0xe1   :  { %v117_v42 = vpop.f32.mrf.mxu0 }
  0xe2   :  { %v118_v43 = vadd.f32 %v324_v41, %v117_v42 }
  0xe3   :  { %v412_v44 = vpop.f32.mrf.mxu0 }
  0xe4   :  { %486 = vtanh.f32 %v118_v43 }
  0xf1   :  { %v487_v45 = vpop.eup %486 }
  0xf2   :  { %446 = vmatmul.mubr.f32.vlgmr.msra.gmra.mxu1 %v487_v45 }
 0x1b2   :  { %v211_v56 = vpop.f32.mrf.mxu1 }
 0x1b3   :  { %v212_v57 = vadd.f32 %v325_v55, %v211_v56 }
 0x1b4   :  { %v447_v58 = vpop.f32.mrf.mxu1 }
 0x1b5   :  { %488 = vtanh.f32 %v212_v57 }
 0x1c2   :  { %v489_v59 = vpop.eup %488 }
 0x1c3   :  { %481 = vmatmul.mubr.f32.vlgmr.msra.gmra.mxu0 %v489_v59 }
 0x283   :  { %v305_v61 = vpop.f32.mrf.mxu0 }
 0x284   :  { %v306_v62 = vadd.f32 %v326_v60, %v305_v61 }
 0x285   :  { %v482_v63 = vpop.f32.mrf.mxu0 }
 0x286   :  { %309 = vst [vmem:[#allocation2] sm:$0xff] %v306_v62 }
 0x287   :  { %501 = shalt.err (!%p498_p4)
}
 0x288   :  { %319 = dma.vmem_to_hbm [thread:$0]  %s317_s5, 128, %s775_s7, [#allocation3]  }
 0x289   :  { %510 = dma.done.wait [#allocation3], 128  }
 0x28a   :  { %511 = vsyncadd [#allocation3], 4294967168 }
 0x28b   :  { %323 = vsyncpa [#allocation3], 1 }

</bundles_post_ra>
